<compile_context>
chip_gen: v7x
topology: tpu7x:2x2x1
jax: 0.10.0
libtpu: 0.0.40
codegen_flags: <defaults>
</compile_context>

<pallas_src>
import jax
import jax.numpy as jnp
from jax.experimental import pallas as pl
from jax.experimental.pallas import tpu as pltpu

LANE = 128
SUBLANE = 8


def _round_up(n, m):
    return ((n + m - 1) // m) * m


def _pad2(a, rows, cols):
    return jnp.pad(a, ((0, rows - a.shape[0]), (0, cols - a.shape[1])))


def mlp_kernel(x_ref, w1_ref, b1_ref, w2_ref, b2_ref, w3_ref, b3_ref, out_ref):
    # x arrives as f32 straight from HBM; the f32->bf16 cast is a VPU op
    # hidden under the x DMA.
    x = x_ref[...].astype(w1_ref.dtype)
    # fc1 + ReLU  (bf16 MXU operands, f32 accumulate / elementwise).
    h1 = jnp.dot(x, w1_ref[...], preferred_element_type=jnp.float32)
    h1 = jnp.maximum(h1 + b1_ref[...], 0.0)
    # fc2 + ReLU
    h2 = jnp.dot(h1.astype(w2_ref.dtype), w2_ref[...],
                 preferred_element_type=jnp.float32)
    h2 = jnp.maximum(h2 + b2_ref[...], 0.0)
    # fc3 (no activation); result stored bf16 to halve output writeback.
    h3 = jnp.dot(h2.astype(w3_ref.dtype), w3_ref[...],
                 preferred_element_type=jnp.float32)
    out_ref[...] = (h3 + b3_ref[...]).astype(out_ref.dtype)


def prepare_params(w1, b1, w2, b2, w3, b3, compute_dtype=jnp.bfloat16):
    """Pad feature dims to lane width 128 and cast weights to bf16 ONCE.

    Padded bias entries are zero and padded hidden units hit zero rows of the
    next weight, so the math is exact.  Weights are stored (in, out), i.e.
    already transposed vs PyTorch's (out, in).
    """
    n_in = w1.shape[0]
    h1_p = _round_up(w1.shape[1], LANE)
    h2_p = _round_up(w2.shape[1], LANE)
    out_p = _round_up(w3.shape[1], LANE)
    w1p = _pad2(w1, n_in, h1_p).astype(compute_dtype)
    w2p = _pad2(w2, h1_p, h2_p).astype(compute_dtype)
    w3p = _pad2(w3, h2_p, out_p).astype(compute_dtype)
    b1p = _pad2(b1.reshape(1, -1), 1, h1_p).astype(jnp.float32)
    b2p = _pad2(b2.reshape(1, -1), 1, h2_p).astype(jnp.float32)
    b3p = _pad2(b3.reshape(1, -1), 1, out_p).astype(jnp.float32)
    return (w1p, b1p, w2p, b2p, w3p, b3p), int(w3.shape[1])


def _pick_batch_tiles(B, batch_tile):
    """Even split of the batch: padding waste < 8 rows, >=2 grid steps when
    possible so both v7x TensorCores get work."""
    b_pad8 = _round_up(max(B, SUBLANE), SUBLANE)
    n_tiles = max(pl.cdiv(b_pad8, batch_tile),
                  2 if b_pad8 >= 2 * SUBLANE else 1)
    tb = _round_up(pl.cdiv(b_pad8, n_tiles), SUBLANE)
    return tb, n_tiles * tb


def mlp_forward(x, params, out_dim, *, batch_tile=1024, out_dtype=jnp.bfloat16):
    """x: (B, n_pixels) f32; params: output of prepare_params (pre-padded)."""
    w1p, b1p, w2p, b2p, w3p, b3p = params
    B, n_in = x.shape
    h1_p, h2_p, out_p = w1p.shape[1], w2p.shape[1], w3p.shape[1]

    tb, b_pad = _pick_batch_tiles(B, batch_tile)
    # Only batch rows are padded (cheap); feature width stays n_in and dtype
    # stays f32 -- no full pad/cast pass over x.
    xp = x if b_pad == B else jnp.pad(x, ((0, b_pad - B), (0, 0)))

    grid = (b_pad // tb,)

    flops = 2 * b_pad * (n_in * h1_p + h1_p * h2_p + h2_p * out_p)
    bytes_accessed = int(
        xp.size * xp.dtype.itemsize
        + sum(int(a.size) * a.dtype.itemsize for a in params)
        + b_pad * out_p * jnp.dtype(out_dtype).itemsize)

    # Rough VMEM need: double-buffered x/out tiles + resident weights (x2) +
    # f32 intermediates.  Only override the scoped limit for oversized tiles
    # (matters on v7x: 64 MiB physical, 32 MiB default scoped).
    vmem_est = (2 * tb * n_in * 4 + 2 * tb * out_p * 2
                + 2 * 2 * (w1p.size + w2p.size + w3p.size)
                + 2 * tb * max(h1_p, h2_p) * 4)
    vmem_limit = (_round_up(2 * int(vmem_est), 1 << 20)
                  if vmem_est > (24 << 20) else None)

    out_padded = pl.pallas_call(
        mlp_kernel,
        out_shape=jax.ShapeDtypeStruct((b_pad, out_p), out_dtype),
        grid=grid,
        in_specs=[
            pl.BlockSpec((tb, n_in), lambda i: (i, 0)),     # x: tiled over batch (f32)
            pl.BlockSpec((n_in, h1_p), lambda i: (0, 0)),   # w1: resident
            pl.BlockSpec((1, h1_p), lambda i: (0, 0)),      # b1: resident
            pl.BlockSpec((h1_p, h2_p), lambda i: (0, 0)),   # w2: resident
            pl.BlockSpec((1, h2_p), lambda i: (0, 0)),      # b2: resident
            pl.BlockSpec((h2_p, out_p), lambda i: (0, 0)),  # w3: resident
            pl.BlockSpec((1, out_p), lambda i: (0, 0)),     # b3: resident
        ],
        out_specs=pl.BlockSpec((tb, out_p), lambda i: (i, 0)),
        compiler_params=pltpu.CompilerParams(
            dimension_semantics=("parallel",),
            vmem_limit_bytes=vmem_limit),
        cost_estimate=pl.CostEstimate(
            flops=flops, transcendentals=0, bytes_accessed=bytes_accessed),
    )(xp, w1p, b1p, w2p, b2p, w3p, b3p)

    # Consumers that can read the lane-dense padded (b_pad, 128) buffer should
    # do so directly; this slice is only for the public (B, out_dim) shape.
    return out_padded[:B, :out_dim]


def init_params(key, n_pixels):
    """Deterministic init mimicking nn.Linear's U(-1/sqrt(fan_in), 1/sqrt(fan_in))."""
    dims = [(n_pixels, 100), (100, 50), (50, 9)]
    params = []
    for i, (fan_in, fan_out) in enumerate(dims):
        kw, kb, key = jax.random.split(jax.random.fold_in(key, i), 3)
        bound = 1.0 / jnp.sqrt(float(fan_in))
        w = jax.random.uniform(kw, (fan_in, fan_out), jnp.float32, -bound, bound)
        b = jax.random.uniform(kb, (1, fan_out), jnp.float32, -bound, bound)
        params += [w, b]
    return params


def reference_forward(x, w1, b1, w2, b2, w3, b3, compute_dtype=jnp.bfloat16):
    """Pure-JAX reference replicating the kernel's bf16 MXU operand casts."""
    c = compute_dtype
    h = jnp.dot(x.astype(c), w1.astype(c), preferred_element_type=jnp.float32) + b1
    h = jnp.maximum(h, 0.0)
    h = jnp.dot(h.astype(c), w2.astype(c), preferred_element_type=jnp.float32) + b2
    h = jnp.maximum(h, 0.0)
    return jnp.dot(h.astype(c), w3.astype(c), preferred_element_type=jnp.float32) + b3


if __name__ == "__main__":
    key = jax.random.PRNGKey(0)
    n_pixels = 64

    kx, kp = jax.random.split(key)
    w1, b1, w2, b2, w3, b3 = init_params(kp, n_pixels)
    prepared, out_dim = prepare_params(w1, b1, w2, b2, w3, b3)

    # Case 1: tiny batch (single grid point, batch tile == 8).
    x_small = jax.random.normal(kx, (8, n_pixels), jnp.float32)
    out_small = jax.block_until_ready(mlp_forward(x_small, prepared, out_dim))
    ref_small = reference_forward(x_small, w1, b1, w2, b2, w3, b3)
    assert out_small.shape == (8, 9), out_small.shape
    assert jnp.allclose(out_small.astype(jnp.float32), ref_small,
                        atol=1e-2, rtol=1e-2), \
        "mismatch vs reference (small batch)"

    # Case 2: larger ragged batch (multi-tile grid: even batch split, batch-row
    # padding, resident weights, parallel/megacore path).
    x_big = jax.random.normal(jax.random.fold_in(kx, 1), (300, n_pixels),
                              jnp.float32)
    out_big = jax.block_until_ready(
        mlp_forward(x_big, prepared, out_dim, batch_tile=1024))
    ref_big = reference_forward(x_big, w1, b1, w2, b2, w3, b3)
    assert out_big.shape == (300, 9), out_big.shape
    assert jnp.allclose(out_big.astype(jnp.float32), ref_big,
                        atol=1e-2, rtol=1e-2), \
        "mismatch vs reference (large batch)"

    print("KERNEL_OK")
</pallas_src>

<mosaic_0001>
module attributes {stable_mosaic.version = 11 : i64} {
  func.func @mlp_kernel(%arg0: i32, %arg1: memref<8x64xf32, #tpu.memory_space<vmem>>, %arg2: memref<64x128xbf16, #tpu.memory_space<vmem>>, %arg3: memref<1x128xf32, #tpu.memory_space<vmem>>, %arg4: memref<128x128xbf16, #tpu.memory_space<vmem>>, %arg5: memref<1x128xf32, #tpu.memory_space<vmem>>, %arg6: memref<128x128xbf16, #tpu.memory_space<vmem>>, %arg7: memref<1x128xf32, #tpu.memory_space<vmem>>, %arg8: memref<8x128xbf16, #tpu.memory_space<vmem>>) attributes {dimension_semantics = [#tpu.dimension_semantics<parallel>], iteration_bounds = array<i64: 1>, scalar_prefetch = 0 : i64, scratch_operands = 0 : i64, tpu.core_type = #tpu.core_type<tc>, window_params = [{transform_indices = @transform_0, window_bounds = array<i64: 8, 64>}, {pipeline_mode = #tpu.pipeline_mode<synchronous>, transform_indices = @transform_1, window_bounds = array<i64: 64, 128>}, {pipeline_mode = #tpu.pipeline_mode<synchronous>, transform_indices = @transform_2, window_bounds = array<i64: 1, 128>}, {pipeline_mode = #tpu.pipeline_mode<synchronous>, transform_indices = @transform_3, window_bounds = array<i64: 128, 128>}, {pipeline_mode = #tpu.pipeline_mode<synchronous>, transform_indices = @transform_4, window_bounds = array<i64: 1, 128>}, {pipeline_mode = #tpu.pipeline_mode<synchronous>, transform_indices = @transform_5, window_bounds = array<i64: 128, 128>}, {pipeline_mode = #tpu.pipeline_mode<synchronous>, transform_indices = @transform_6, window_bounds = array<i64: 1, 128>}, {transform_indices = @transform_7, window_bounds = array<i64: 8, 128>}]} {
    %c0 = arith.constant 0 : index
    %c0_0 = arith.constant 0 : index
    %0 = vector.load %arg1[%c0, %c0_0] : memref<8x64xf32, #tpu.memory_space<vmem>>, vector<8x64xf32>
    %1 = arith.truncf %0 : vector<8x64xf32> to vector<8x64xbf16>
    %c0_1 = arith.constant 0 : index
    %c0_2 = arith.constant 0 : index
    %2 = vector.load %arg2[%c0_1, %c0_2] : memref<64x128xbf16, #tpu.memory_space<vmem>>, vector<64x128xbf16>
    %cst = arith.constant dense<0.000000e+00> : vector<8x128xf32>
    %3 = tpu.matmul %1, %2, %cst {dimension_numbers = #tpu.dot_dimension_numbers<[1], [0], [0], [1], [0, 0, 1, 1], [], []>} : vector<8x64xbf16>, vector<64x128xbf16>, vector<8x128xf32> -> vector<8x128xf32>
    %c0_3 = arith.constant 0 : index
    %c0_4 = arith.constant 0 : index
    %4 = vector.load %arg3[%c0_3, %c0_4] : memref<1x128xf32, #tpu.memory_space<vmem>>, vector<1x128xf32>
    %5 = vector.broadcast %4 : vector<1x128xf32> to vector<8x128xf32>
    %6 = arith.addf %3, %5 : vector<8x128xf32>
    %cst_5 = arith.constant 0.000000e+00 : f32
    %7 = vector.broadcast %cst_5 : f32 to vector<8x128xf32>
    %8 = arith.maximumf %6, %7 : vector<8x128xf32>
    %9 = arith.truncf %8 : vector<8x128xf32> to vector<8x128xbf16>
    %c0_6 = arith.constant 0 : index
    %c0_7 = arith.constant 0 : index
    %10 = vector.load %arg4[%c0_6, %c0_7] : memref<128x128xbf16, #tpu.memory_space<vmem>>, vector<128x128xbf16>
    %cst_8 = arith.constant dense<0.000000e+00> : vector<8x128xf32>
    %11 = tpu.matmul %9, %10, %cst_8 {dimension_numbers = #tpu.dot_dimension_numbers<[1], [0], [0], [1], [0, 0, 1, 1], [], []>} : vector<8x128xbf16>, vector<128x128xbf16>, vector<8x128xf32> -> vector<8x128xf32>
    %c0_9 = arith.constant 0 : index
    %c0_10 = arith.constant 0 : index
    %12 = vector.load %arg5[%c0_9, %c0_10] : memref<1x128xf32, #tpu.memory_space<vmem>>, vector<1x128xf32>
    %13 = vector.broadcast %12 : vector<1x128xf32> to vector<8x128xf32>
    %14 = arith.addf %11, %13 : vector<8x128xf32>
    %cst_11 = arith.constant 0.000000e+00 : f32
    %15 = vector.broadcast %cst_11 : f32 to vector<8x128xf32>
    %16 = arith.maximumf %14, %15 : vector<8x128xf32>
    %17 = arith.truncf %16 : vector<8x128xf32> to vector<8x128xbf16>
    %c0_12 = arith.constant 0 : index
    %c0_13 = arith.constant 0 : index
    %18 = vector.load %arg6[%c0_12, %c0_13] : memref<128x128xbf16, #tpu.memory_space<vmem>>, vector<128x128xbf16>
    %cst_14 = arith.constant dense<0.000000e+00> : vector<8x128xf32>
    %19 = tpu.matmul %17, %18, %cst_14 {dimension_numbers = #tpu.dot_dimension_numbers<[1], [0], [0], [1], [0, 0, 1, 1], [], []>} : vector<8x128xbf16>, vector<128x128xbf16>, vector<8x128xf32> -> vector<8x128xf32>
    %c0_15 = arith.constant 0 : index
    %c0_16 = arith.constant 0 : index
    %20 = vector.load %arg7[%c0_15, %c0_16] : memref<1x128xf32, #tpu.memory_space<vmem>>, vector<1x128xf32>
    %21 = vector.broadcast %20 : vector<1x128xf32> to vector<8x128xf32>
    %22 = arith.addf %19, %21 : vector<8x128xf32>
    %23 = arith.truncf %22 : vector<8x128xf32> to vector<8x128xbf16>
    %c0_17 = arith.constant 0 : index
    %c0_18 = arith.constant 0 : index
    %24 = vector.load %arg8[%c0_17, %c0_18] : memref<8x128xbf16, #tpu.memory_space<vmem>>, vector<8x128xbf16>
    tpu.vector_store %arg8[%c0_17, %c0_18], %23 {strides = array<i32>} : memref<8x128xbf16, #tpu.memory_space<vmem>>, vector<8x128xbf16>,
    return
  }
  func.func @transform_0(%arg0: i32) -> (i32, i32) {
    %c0_i32 = arith.constant 0 : i32
    %c0_i32_0 = arith.constant 0 : i32
    return %arg0, %c0_i32 : i32, i32
  }
  func.func @transform_1(%arg0: i32) -> (i32, i32) {
    %c0_i32 = arith.constant 0 : i32
    %c0_i32_0 = arith.constant 0 : i32
    %c0_i32_1 = arith.constant 0 : i32
    return %c0_i32, %c0_i32_0 : i32, i32
  }
  func.func @transform_2(%arg0: i32) -> (i32, i32) {
    %c0_i32 = arith.constant 0 : i32
    %c0_i32_0 = arith.constant 0 : i32
    %c0_i32_1 = arith.constant 0 : i32
    return %c0_i32, %c0_i32_0 : i32, i32
  }
  func.func @transform_3(%arg0: i32) -> (i32, i32) {
    %c0_i32 = arith.constant 0 : i32
    %c0_i32_0 = arith.constant 0 : i32
    %c0_i32_1 = arith.constant 0 : i32
    return %c0_i32, %c0_i32_0 : i32, i32
  }
  func.func @transform_4(%arg0: i32) -> (i32, i32) {
    %c0_i32 = arith.constant 0 : i32
    %c0_i32_0 = arith.constant 0 : i32
    %c0_i32_1 = arith.constant 0 : i32
    return %c0_i32, %c0_i32_0 : i32, i32
  }
  func.func @transform_5(%arg0: i32) -> (i32, i32) {
    %c0_i32 = arith.constant 0 : i32
    %c0_i32_0 = arith.constant 0 : i32
    %c0_i32_1 = arith.constant 0 : i32
    return %c0_i32, %c0_i32_0 : i32, i32
  }
  func.func @transform_6(%arg0: i32) -> (i32, i32) {
    %c0_i32 = arith.constant 0 : i32
    %c0_i32_0 = arith.constant 0 : i32
    %c0_i32_1 = arith.constant 0 : i32
    return %c0_i32, %c0_i32_0 : i32, i32
  }
  func.func @transform_7(%arg0: i32) -> (i32, i32) {
    %c0_i32 = arith.constant 0 : i32
    %c0_i32_0 = arith.constant 0 : i32
    return %arg0, %c0_i32 : i32, i32
  }
}

</mosaic_0001>

<bundles_post_ra>
// kernel: tpu_custom_call.1
= control target key start
LH: loop header
LB: loop body
LE: loop exit
PB: predicated region body
PF: predicated region fallthrough
CT: control target
= control target key end

     0   :  { %12 = vsyncpa [#allocation3], 0  ;;  %s810_s0 = inlined_call_operand.hbm [shape: f32[8,64], index: 0, kind: input, shape index: {}]   ;;  %s811_s1 = inlined_call_operand.hbm [shape: bf16[64,128], index: 1, kind: input, shape index: {}]   ;;  %s812_s2 = inlined_call_operand.vmem [shape: f32[1,128], index: 2, kind: input, shape index: {}]   ;;  %s813_s3 = inlined_call_operand.hbm [shape: bf16[128,128], index: 3, kind: input, shape index: {}]   ;;  %s814_s4 = inlined_call_operand.vmem [shape: f32[1,128], index: 4, kind: input, shape index: {}]   ;;  %s815_s5 = inlined_call_operand.hbm [shape: bf16[128,128], index: 5, kind: input, shape index: {}]   ;;  %s816_s6 = inlined_call_operand.vmem [shape: f32[1,128], index: 6, kind: input, shape index: {}]   ;;  %s817_s7 = inlined_call_operand.hbm [shape: bf16[8,128], index: 7, kind: output, shape index: {}]  }
   0x1   :  { %13 = vsyncpa [#allocation6], 0 }
   0x2   :  { %14 = vsyncpa [#allocation9], 0 }
   0x3   :  { %15 = vsyncpa [#allocation4], 0  ;;  %s657_s24 = smov [#allocation5]   ;;  %s539_s28 = scalar_lea.hbm %s811_s1, 512 }
   0x4   :  { %s31_s25 = sshll.u32 %s657_s24, 4  ;;  %p540_p0 = scmp.ne.s32.totalorder %s811_s1, %s539_s28  ;;  %s32_s25 = int_to_ptr.vmem [resolvable:$true] %s31_s25 }
   0x5   :  { %p543_p1 = scmp.lt.u32.totalorder %s539_s28, %s811_s1 }
   0x7   :  { %p545_p2 = pnand %p543_p1, %p540_p0 }
   0x9   :  { %548 = shalt.err (!%p545_p2)
}
   0xa   :  { %s549_s10 = scalar_lea.vmem %s32_s25, 512  ;;  %p554_p4 = scmp.lt.s32.totalorder %s32_s25, %s32_s25 }
   0xb   :  { %p550_p3 = scmp.ne.s32.totalorder %s32_s25, %s549_s10  ;;  %p555_p5 = scmp.lt.s32.totalorder %s549_s10, %s549_s10 }
   0xd   :  { %p556_p6 = por %p555_p5, %p554_p4 }
   0xf   :  { %p557_p7 = pnand %p556_p6, %p550_p3 }
  0x11   :  { %560 = shalt.err (!%p557_p7)
}
  0x12   :  { %s658_s11 = smov 64   ;;  %s659_s12 = smov 4  }
  0x13   :  { %37 = dma.hbm_to_vmem [thread:$0]  %s811_s1, 512, %s32_s25, [#allocation6], %s658_s11, %s658_s11, %s659_s12  }
  0x14   :  { %s660_s15 = smov [#allocation2]   ;;  %s661_s17 = smov [#allocation7]  }
  0x15   :  { %s22_s16 = sshll.u32 %s660_s15, 4  ;;  %s45_s18 = sshll.u32 %s661_s17, 4  ;;  %s23_s16 = int_to_ptr.vmem [resolvable:$true] %s22_s16  ;;  %s46_s18 = int_to_ptr.vmem [resolvable:$true] %s45_s18 }
  0x16   :  { %s561_s21 = scalar_lea.hbm %s810_s0, 128 }
  0x17   :  { %p562_p8 = scmp.ne.s32.totalorder %s810_s0, %s561_s21  ;;  %p565_p9 = scmp.lt.u32.totalorder %s561_s21, %s810_s0 }
  0x19   :  { %p567_p10 = pnand %p565_p9, %p562_p8 }
  0x1b   :  { %570 = shalt.err (!%p567_p10)
}
  0x1c   :  { %s571_s1 = scalar_lea.vmem %s23_s16, 128  ;;  %p576_p12 = scmp.lt.s32.totalorder %s23_s16, %s23_s16 }
  0x1d   :  { %p572_p11 = scmp.ne.s32.totalorder %s23_s16, %s571_s1  ;;  %p577_p13 = scmp.lt.s32.totalorder %s571_s1, %s571_s1 }
  0x1f   :  { %p578_p0 = por %p577_p13, %p576_p12 }
  0x21   :  { %p579_p1 = pnand %p578_p0, %p572_p11 }
  0x23   :  { %582 = shalt.err (!%p579_p1)
}
  0x24   :  { %25 = dma.hbm_to_vmem [thread:$0]  %s810_s0, 128, %s23_s16, [#allocation3]  }
  0x25   :  { %s583_s30 = scalar_lea.hbm %s813_s3, 1024 }
  0x26   :  { %p584_p2 = scmp.ne.s32.totalorder %s813_s3, %s583_s30  ;;  %p587_p3 = scmp.lt.u32.totalorder %s583_s30, %s813_s3 }
  0x28   :  { %p589_p4 = pnand %p587_p3, %p584_p2 }
  0x2a   :  { %592 = shalt.err (!%p589_p4)
}
  0x2b   :  { %s593_s14 = scalar_lea.vmem %s46_s18, 1024  ;;  %p598_p6 = scmp.lt.s32.totalorder %s46_s18, %s46_s18 }
  0x2c   :  { %p594_p5 = scmp.ne.s32.totalorder %s46_s18, %s593_s14  ;;  %p599_p7 = scmp.lt.s32.totalorder %s593_s14, %s593_s14 }
  0x2e   :  { %p600_p8 = por %p599_p7, %p598_p6 }
  0x30   :  { %p601_p9 = pnand %p600_p8, %p594_p5 }
  0x32   :  { %604 = shalt.err (!%p601_p9)
}
  0x33   :  { %51 = dma.hbm_to_vmem [thread:$0]  %s813_s3, 1024, %s46_s18, [#allocation6], %s658_s11, %s658_s11, %s659_s12  }
  0x34   :  { %s662_s16 = smov [#allocation8]   ;;  %s605_s21 = scalar_lea.hbm %s815_s5, 1024 }
  0x35   :  { %s59_s17 = sshll.u32 %s662_s16, 4  ;;  %p606_p10 = scmp.ne.s32.totalorder %s815_s5, %s605_s21  ;;  %s60_s17 = int_to_ptr.vmem [resolvable:$true] %s59_s17 }
  0x36   :  { %p609_p11 = scmp.lt.u32.totalorder %s605_s21, %s815_s5 }
  0x38   :  { %p611_p12 = pnand %p609_p11, %p606_p10 }
  0x3a   :  { %614 = shalt.err (!%p611_p12)
}
  0x3b   :  { %s615_s1 = scalar_lea.vmem %s60_s17, 1024  ;;  %p620_p0 = scmp.lt.s32.totalorder %s60_s17, %s60_s17 }
  0x3c   :  { %p616_p13 = scmp.ne.s32.totalorder %s60_s17, %s615_s1  ;;  %p621_p1 = scmp.lt.s32.totalorder %s615_s1, %s615_s1 }
  0x3e   :  { %p622_p2 = por %p621_p1, %p620_p0 }
  0x40   :  { %p623_p3 = pnand %p622_p2, %p616_p13 }
  0x42   :  { %626 = shalt.err (!%p623_p3)
}
  0x43   :  { %65 = dma.hbm_to_vmem [thread:$0]  %s815_s5, 1024, %s60_s17, [#allocation9], %s658_s11, %s658_s11, %s659_s12  }
  0x44   :  { %649 = dma.done.wait [#allocation3], 128  }
  0x45   :  { %650 = vsyncadd [#allocation3], 4294967168 }
  0x46   :  { %651 = dma.done.wait [#allocation6], 1536  }
  0x47   :  { %652 = vsyncadd [#allocation6], 4294965760 }
  0x48   :  { %653 = dma.done.wait [#allocation9], 1024  }
  0x49   :  { %654 = vsyncadd [#allocation9], 4294966272  ;;  %v663_v0 = vmov 0.0   ;;  %vm664_vm0 = vmmov 0   ;;  %v519_v1 = vld [vmem:[#allocation5] sm:$0xff]   ;;  %v520_v2 = vld [vmem:[#allocation5 + $0x8] sm:$0xff]  }
  0x4a   :  { %458 = vmatprep.subr.bf16.mxu0 %v663_v0  ;;  %466 = vmatprep.mubr.msk.bf16.mxu0 %vm664_vm0, %v663_v0  ;;  %v523_v3 = vld [vmem:[#allocation7] sm:$0xff]   ;;  %v521_v4 = vld [vmem:[#allocation5 + $0x10] sm:$0xff]   ;;  %v524_v5 = vld [vmem:[#allocation7 + $0x8] sm:$0xff]   ;;  %vm122_vm1 = vcmask 523264   ;;  %s665_s28 = smov [#allocation10]  }
  0x4b   :  { %470 = vmatprep.subr.bf16.mxu1 %v663_v0  ;;  %486 = vmatprep.mubr.msk.bf16.mxu1 %vm664_vm0, %v663_v0  ;;  %v522_v6 = vld [vmem:[#allocation5 + $0x18] sm:$0xff]   ;;  %v525_v8 = vld [vmem:[#allocation7 + $0x10] sm:$0xff]   ;;  %v527_v11 = vld [vmem:[#allocation7 + $0x20] sm:$0xff]   ;;  %s400_s29 = sshll.u32 %s665_s28, 4  ;;  %s401_s29 = int_to_ptr.vmem [resolvable:$true] %s400_s29 }
  0x4c   :  { %459 = vmatpush3.bf16.msra.mxu0 %v519_v1  ;;  %471 = vmatpush3.bf16.msra.mxu1 %v523_v3  ;;  %v81_v7 = vld [vmem:[#allocation2] sm:$0xff]  ;;  %v528_v12 = vld [vmem:[#allocation7 + $0x28] sm:$0xff]   ;;  %v529_v13 = vld [vmem:[#allocation7 + $0x30] sm:$0xff]   ;;  %p632_p5 = scmp.lt.s32.totalorder %s401_s29, %s401_s29 }
  0x4d   :  { %460 = vmatprep.subr.bf16.mxu0 %v663_v0  ;;  %472 = vmatprep.subr.bf16.mxu1 %v663_v0  ;;  %v82_v9 = vpack.c.bf16 %v81_v7, %v81_v7  ;;  %v526_v10 = vld [vmem:[#allocation7 + $0x18] sm:$0xff]   ;;  %v531_v15 = vld [vmem:[#allocation8] sm:$0xff]   ;;  %v532_v16 = vld [vmem:[#allocation8 + $0x8] sm:$0xff]  }
  0x4e   :  { %v530_v14 = vld [vmem:[#allocation7 + $0x38] sm:$0xff]   ;;  %v533_v17 = vld [vmem:[#allocation8 + $0x10] sm:$0xff]   ;;  %v535_v19 = vld [vmem:[#allocation8 + $0x20] sm:$0xff]  }
  0x4f   :  { %v534_v18 = vld [vmem:[#allocation8 + $0x18] sm:$0xff]   ;;  %v536_v20 = vld [vmem:[#allocation8 + $0x28] sm:$0xff]   ;;  %v537_v29 = vld [vmem:[#allocation8 + $0x30] sm:$0xff]  }
  0x50   :  { %461 = vmatpush3.bf16.msra.mxu0 %v520_v2  ;;  %473 = vmatpush3.bf16.msra.mxu1 %v524_v5  ;;  %v411_v21 = vld [vmem:[%s812_s2] ss:$0 sm:$0xff] }
  0x51   :  { %462 = vmatprep.subr.bf16.mxu0 %v663_v0  ;;  %474 = vmatprep.subr.bf16.mxu1 %v663_v0  ;;  %v538_v30 = vld [vmem:[#allocation8 + $0x38] sm:$0xff]  }
  0x52   :  { %v417_v31 = vld [vmem:[%s814_s4] ss:$0 sm:$0xff]  ;;  %s627_s4 = scalar_lea.vmem %s401_s29, 64 }
  0x53   :  { %v426_v39 = vld [vmem:[%s816_s6] ss:$0 sm:$0xff]  ;;  %p628_p4 = scmp.ne.s32.totalorder %s401_s29, %s627_s4  ;;  %p633_p6 = scmp.lt.s32.totalorder %s627_s4, %s627_s4 }
  0x54   :  { %463 = vmatpush3.bf16.msra.mxu0 %v521_v4  ;;  %475 = vmatpush3.bf16.msra.mxu1 %v525_v8 }
  0x55   :  { %464 = vmatprep.subr.bf16.mxu0 %v663_v0  ;;  %476 = vmatprep.subr.bf16.mxu1 %v663_v0  ;;  %p634_p7 = por %p633_p6, %p632_p5 }
  0x57   :  { %p635_p8 = pnand %p634_p7, %p628_p4 }
  0x58   :  { %465 = vmatpush3.bf16.msra.mxu0 %v522_v6  ;;  %477 = vmatpush3.bf16.msra.mxu1 %v526_v10 }
  0x59   :  { %490 = vmatprep.subr.bf16.mxu0 %v663_v0  ;;  %478 = vmatprep.subr.bf16.mxu1 %v663_v0 }
  0x5b   :  { %467 = vmatmul.mubr.msk.bf16.vlgmr.msra.gmra.mrb[0].mxu0 %vm122_vm1, %v82_v9 }
  0x5c   :  { %506 = vmatprep.mubr.msk.bf16.mxu0 %vm664_vm0, %v663_v0  ;;  %479 = vmatpush3.bf16.msra.mxu1 %v527_v11 }
  0x5d   :  { %480 = vmatprep.subr.bf16.mxu1 %v663_v0  ;;  %491 = vmatpush3.bf16.msra.mxu0 %v531_v15 }
  0x5e   :  { %492 = vmatprep.subr.bf16.mxu0 %v663_v0 }
  0x60   :  { %481 = vmatpush3.bf16.msra.mxu1 %v528_v12 }
  0x61   :  { %482 = vmatprep.subr.bf16.mxu1 %v663_v0  ;;  %493 = vmatpush3.bf16.msra.mxu0 %v532_v16 }
  0x62   :  { %494 = vmatprep.subr.bf16.mxu0 %v663_v0 }
  0x64   :  { %483 = vmatpush3.bf16.msra.mxu1 %v529_v13 }
  0x65   :  { %484 = vmatprep.subr.bf16.mxu1 %v663_v0  ;;  %495 = vmatpush3.bf16.msra.mxu0 %v533_v17 }
  0x66   :  { %496 = vmatprep.subr.bf16.mxu0 %v663_v0 }
  0x68   :  { %485 = vmatpush3.bf16.msra.mxu1 %v530_v14 }
  0x69   :  { %497 = vmatpush3.bf16.msra.mxu0 %v534_v18 }
  0x6a   :  { %498 = vmatprep.subr.bf16.mxu0 %v663_v0 }
  0x6d   :  { %499 = vmatpush3.bf16.msra.mxu0 %v535_v19 }
  0x6e   :  { %500 = vmatprep.subr.bf16.mxu0 %v663_v0 }
  0x71   :  { %501 = vmatpush3.bf16.msra.mxu0 %v536_v20 }
  0x72   :  { %502 = vmatprep.subr.bf16.mxu0 %v663_v0 }
  0x75   :  { %503 = vmatpush3.bf16.msra.mxu0 %v537_v29 }
  0x76   :  { %504 = vmatprep.subr.bf16.mxu0 %v663_v0 }
  0x79   :  { %505 = vmatpush3.bf16.msra.mxu0 %v538_v30 }
 0x12e   :  { %v160_v22 = vpop.f32.mrb[0].mxu0 }
 0x12f   :  { %v161_v23 = vadd.f32 %v411_v21, %v160_v22  ;;  %v468_v24 = vpop.f32.mrb[1].mxu0 }
 0x130   :  { %v163_v25 = vpop.f32.mrb[2].mxu0 }
 0x131   :  { %v166_v26 = vmax.f32 %v161_v23, 0.0  ;;  %v469_v27 = vpop.f32.mrb[3].mxu0 }
 0x133   :  { %v167_v28 = vpack.c.bf16 %v166_v26, %v166_v26 }
 0x135   :  { %487 = vmatmul.mubr.bf16.vlgmr.msra.gmra.mrb[0].mxu1 %v167_v28 }
 0x208   :  { %v273_v32 = vpop.f32.mrb[0].mxu1 }
 0x209   :  { %v274_v33 = vadd.f32 %v417_v31, %v273_v32  ;;  %v488_v34 = vpop.f32.mrb[1].mxu1 }
 0x20a   :  { %v276_v35 = vpop.f32.mrb[2].mxu1 }
 0x20b   :  { %v279_v36 = vmax.f32 %v274_v33, 0.0  ;;  %v489_v37 = vpop.f32.mrb[3].mxu1 }
 0x20d   :  { %v280_v38 = vpack.c.bf16 %v279_v36, %v279_v36 }
 0x20f   :  { %507 = vmatmul.mubr.bf16.vlgmr.msra.gmra.mrb[4].mxu0 %v280_v38 }
 0x2e2   :  { %v386_v40 = vpop.f32.mrb[4].mxu0 }
 0x2e3   :  { %v387_v41 = vadd.f32 %v426_v39, %v386_v40  ;;  %v508_v42 = vpop.f32.mrb[5].mxu0 }
 0x2e4   :  { %v389_v43 = vpop.f32.mrb[6].mxu0 }
 0x2e5   :  { %v392_v44 = vpack.c.bf16 %v387_v41, %v387_v41  ;;  %v509_v45 = vpop.f32.mrb[7].mxu0 }
 0x2e7   :  { %393 = vst [vmem:[#allocation10] sm:$0xf] %v392_v44 }
 0x2e8   :  { %638 = shalt.err (!%p635_p8)
}
 0x2e9   :  { %s639_s6 = scalar_lea.hbm %s817_s7, 64 }
 0x2ea   :  { %p640_p9 = scmp.ne.s32.totalorder %s817_s7, %s639_s6  ;;  %p643_p10 = scmp.lt.u32.totalorder %s639_s6, %s817_s7 }
 0x2ec   :  { %p645_p11 = pnand %p643_p10, %p640_p9 }
 0x2ee   :  { %648 = shalt.err (!%p645_p11)
}
 0x2ef   :  { %403 = dma.vmem_to_hbm [thread:$0]  %s401_s29, 64, %s817_s7, [#allocation4]  }
 0x2f0   :  { %655 = dma.done.wait [#allocation4], 64  }
 0x2f1   :  { %656 = vsyncadd [#allocation4], 4294967232 }
 0x2f2   :  { %407 = vsyncpa [#allocation3], 1 }
 0x2f3   :  { %408 = vsyncpa [#allocation6], 1 }
 0x2f4   :  { %409 = vsyncpa [#allocation9], 1 }
 0x2f5   :  { %410 = vsyncpa [#allocation4], 1 }

</bundles_post_ra>
